<compile_context>
chip_gen: v6e
topology: v6e:2x2x1
jax: 0.10.0
libtpu: 0.0.40
codegen_flags: <defaults>
</compile_context>

<pallas_src>
import math
import jax
import jax.numpy as jnp
from jax.experimental import pallas as pl
from jax.experimental.pallas import tpu as pltpu


def make_positional_encoding(d_model: int, max_len: int = 130) -> jnp.ndarray:
    """Deterministic buffer construction, identical to the PyTorch __init__."""
    position = jnp.arange(0, max_len, dtype=jnp.float32)[:, None]            # (max_len, 1)
    div_term = jnp.exp(jnp.arange(0, d_model, 2, dtype=jnp.float32)
                       * (-math.log(10000.0) / d_model))                     # (ceil(d/2),)
    pe = jnp.zeros((max_len, d_model), dtype=jnp.float32)
    pe = pe.at[:, 0::2].set(jnp.sin(position * div_term))
    # NOTE: for odd d_model PyTorch would error; we clamp instead (benign).
    pe = pe.at[:, 1::2].set(jnp.cos(position * div_term[: d_model // 2]))
    return pe


def _pe_add_kernel(x_ref, pe_ref, o_ref):
    # x_ref/o_ref: (TB, TS, D); pe_ref: (1, TS, D).
    # Leading-axis broadcast is free vreg reuse on the VPU (no XLU cost).
    o_ref[...] = x_ref[...] + pe_ref[...]


def _choose_tiles(B: int, S: int, D: int, dtype_bytes: int, target_bytes: int):
    """Pick (TB, TS): TS is the full seq dim or a multiple of 8; TB divides B.

    Each x/out buffer stays <= target_bytes so the (double-buffered) working set
    fits comfortably in scoped VMEM on v5e/v6e/v7x while keeping per-step DMAs
    in the multi-MiB range.
    """
    row_bytes = D * dtype_bytes
    if S * row_bytes <= target_bytes:
        TS = S                                        # full dim: always layout-legal
    else:
        TS = max(8, (target_bytes // row_bytes) // 8 * 8)   # multiple of 8
        TS = min(TS, S)
    TB = 1
    for tb in range(1, B + 1):
        if B % tb == 0 and tb * TS * row_bytes <= target_bytes:
            TB = tb
    return TB, TS


def positional_encoding_forward(x: jnp.ndarray, pe: jnp.ndarray,
                                *, target_bytes: int = 4 * 1024 * 1024) -> jnp.ndarray:
    """x: (B, S, D); pe: (max_len, D). Returns x + pe[:S] broadcast over batch."""
    B, S, D = x.shape
    max_len, d = pe.shape
    assert S <= max_len, f"sequence length {S} exceeds max_len {max_len}"
    assert d == D, "pe d_model mismatch"

    TB, TS = _choose_tiles(B, S, D, jnp.dtype(x.dtype).itemsize, target_bytes)
    n_s = pl.cdiv(S, TS)
    S_pad = n_s * TS
    n_b = B // TB

    pe_slice = pe[:S].astype(x.dtype)[None, :, :]            # (1, S, D)
    if S_pad != S:
        # Zero-pad the ragged seq tail on the host; the padded rows are sliced
        # off the output, so numerics are unaffected.
        x_in = jnp.pad(x, ((0, 0), (0, S_pad - S), (0, 0)))
        pe_in = jnp.pad(pe_slice, ((0, 0), (0, S_pad - S), (0, 0)))
    else:
        x_in, pe_in = x, pe_slice

    if n_s >= 2:
        # Seq tiles outermost: pe's block index is constant across the inner
        # batch axis -> its DMA is elided (pe read from HBM exactly once), and
        # the leading "parallel" axis has >= 2 steps for v7x megacore sharding.
        grid = (n_s, n_b)
        x_map = lambda s, b: (b, s, 0)
        pe_map = lambda s, b: (0, s, 0)
    else:
        # Single seq tile: pe is read once no matter what; put batch tiles
        # outermost so the leading parallel axis carries all the steps.
        grid = (n_b, n_s)
        x_map = lambda b, s: (b, s, 0)
        pe_map = lambda b, s: (0, s, 0)

    out = pl.pallas_call(
        _pe_add_kernel,
        out_shape=jax.ShapeDtypeStruct((B, S_pad, D), x.dtype),
        grid=grid,
        in_specs=[
            pl.BlockSpec((TB, TS, D), x_map),    # x tile
            pl.BlockSpec((1, TS, D), pe_map),    # pe tile (shared over batch)
        ],
        out_specs=pl.BlockSpec((TB, TS, D), x_map),
        compiler_params=pltpu.CompilerParams(
            # Both grid axes are fully independent.
            dimension_semantics=("parallel", "parallel"),
            # Covers 2x(x + out + pe) 4 MiB-class buffers; needed on v5e whose
            # scoped default is 16 MiB, safe on v7x's 64 MiB physical VMEM.
            vmem_limit_bytes=48 * 1024 * 1024,
        ),
    )(x_in, pe_in)

    return out[:, :S, :] if S_pad != S else out


if __name__ == "__main__":
    # Small shapes consistent with the module's forward: (batch, seq, d_model).
    B, S, D = 2, 8, 512
    max_len = 130

    key = jax.random.PRNGKey(0)
    x = jax.random.normal(key, (B, S, D), dtype=jnp.float32)

    pe = make_positional_encoding(D, max_len)

    out = positional_encoding_forward(x, pe)
    out = jax.block_until_ready(out)

    # Reference check in plain JAX.
    ref = x + pe[:S][None, :, :]
    assert out.shape == (B, S, D)
    assert jnp.allclose(out, ref, atol=1e-6), "mismatch vs reference"

    print("KERNEL_OK")
</pallas_src>

<mosaic_0001>
module attributes {stable_mosaic.version = 11 : i64} {
  func.func @_pe_add_kernel(%arg0: i32, %arg1: i32, %arg2: memref<2x8x512xf32, #tpu.memory_space<vmem>>, %arg3: memref<1x8x512xf32, #tpu.memory_space<vmem>>, %arg4: memref<2x8x512xf32, #tpu.memory_space<vmem>>) attributes {dimension_semantics = [#tpu.dimension_semantics<parallel>, #tpu.dimension_semantics<parallel>], iteration_bounds = array<i64: 1, 1>, scalar_prefetch = 0 : i64, scratch_operands = 0 : i64, tpu.core_type = #tpu.core_type<tc>, window_params = [{transform_indices = @transform_0, window_bounds = array<i64: 2, 8, 512>}, {transform_indices = @transform_1, window_bounds = array<i64: 1, 8, 512>}, {transform_indices = @transform_2, window_bounds = array<i64: 2, 8, 512>}]} {
    %c0 = arith.constant 0 : index
    %c0_0 = arith.constant 0 : index
    %c0_1 = arith.constant 0 : index
    %0 = vector.load %arg2[%c0, %c0_0, %c0_1] : memref<2x8x512xf32, #tpu.memory_space<vmem>>, vector<2x8x512xf32>
    %c0_2 = arith.constant 0 : index
    %c0_3 = arith.constant 0 : index
    %c0_4 = arith.constant 0 : index
    %1 = vector.load %arg3[%c0_2, %c0_3, %c0_4] : memref<1x8x512xf32, #tpu.memory_space<vmem>>, vector<1x8x512xf32>
    %2 = vector.broadcast %1 : vector<1x8x512xf32> to vector<2x8x512xf32>
    %3 = arith.addf %0, %2 : vector<2x8x512xf32>
    %c0_5 = arith.constant 0 : index
    %c0_6 = arith.constant 0 : index
    %c0_7 = arith.constant 0 : index
    %4 = vector.load %arg4[%c0_5, %c0_6, %c0_7] : memref<2x8x512xf32, #tpu.memory_space<vmem>>, vector<2x8x512xf32>
    tpu.vector_store %arg4[%c0_5, %c0_6, %c0_7], %3 {strides = array<i32>} : memref<2x8x512xf32, #tpu.memory_space<vmem>>, vector<2x8x512xf32>,
    return
  }
  func.func @transform_0(%arg0: i32, %arg1: i32) -> (i32, i32, i32) {
    %c0_i32 = arith.constant 0 : i32
    %c0_i32_0 = arith.constant 0 : i32
    return %arg0, %arg1, %c0_i32 : i32, i32, i32
  }
  func.func @transform_1(%arg0: i32, %arg1: i32) -> (i32, i32, i32) {
    %c0_i32 = arith.constant 0 : i32
    %c0_i32_0 = arith.constant 0 : i32
    %c0_i32_1 = arith.constant 0 : i32
    return %c0_i32, %arg1, %c0_i32_0 : i32, i32, i32
  }
  func.func @transform_2(%arg0: i32, %arg1: i32) -> (i32, i32, i32) {
    %c0_i32 = arith.constant 0 : i32
    %c0_i32_0 = arith.constant 0 : i32
    return %arg0, %arg1, %c0_i32 : i32, i32, i32
  }
}

</mosaic_0001>

<bundles_post_ra>
// kernel: tpu_custom_call.1
= control target key start
LH: loop header
LB: loop body
LE: loop exit
PB: predicated region body
PF: predicated region fallthrough
CT: control target
= control target key end

     0   :  { %7 = vsyncpa [#allocation3], 0  ;;  %s190_s0 = inlined_call_operand.hbm [shape: f32[2,8,512], index: 0, kind: input, shape index: {}]   ;;  %s191_s1 = inlined_call_operand.hbm [shape: f32[1,8,512], index: 1, kind: input, shape index: {}]   ;;  %s192_s2 = inlined_call_operand.hbm [shape: f32[2,8,512], index: 2, kind: output, shape index: {}]  }
   0x1   :  { %8 = vsyncpa [#allocation6], 0 }
   0x2   :  { %9 = vsyncpa [#allocation4], 0  ;;  %s155_s9 = smov [#allocation2]  }
   0x3   :  { %s15_s10 = sshll.u32 %s155_s9, 4  ;;  %s16_s10 = int_to_ptr.vmem [resolvable:$true] %s15_s10 }
   0x4   :  { %s97_s11 = scalar_lea.vmem %s16_s10, 1024  ;;  %p102_p1 = scmp.lt.s32.totalorder %s16_s10, %s16_s10 }
   0x5   :  { %p98_p0 = scmp.ne.s32.totalorder %s16_s10, %s97_s11  ;;  %p103_p2 = scmp.lt.s32.totalorder %s97_s11, %s97_s11 }
   0x7   :  { %p104_p3 = por %p103_p2, %p102_p1 }
   0x9   :  { %p105_p4 = pnand %p104_p3, %p98_p0 }
   0xb   :  { %108 = shalt.err (!%p105_p4)
}
   0xc   :  { %s156_s12 = smov 512   ;;  %s157_s13 = smov 32  }
   0xd   :  { %21 = dma.hbm_to_vmem [thread:$0]  %s190_s0, 1024, %s16_s10, [#allocation3], %s156_s12, %s156_s12, %s157_s13  }
   0xe   :  { %s158_s16 = smov [#allocation5]  }
   0xf   :  { %s28_s17 = sshll.u32 %s158_s16, 4  ;;  %s29_s17 = int_to_ptr.vmem [resolvable:$true] %s28_s17 }
  0x10   :  { %s117_s18 = scalar_lea.vmem %s29_s17, 512  ;;  %p122_p6 = scmp.lt.s32.totalorder %s29_s17, %s29_s17 }
  0x11   :  { %p118_p5 = scmp.ne.s32.totalorder %s29_s17, %s117_s18  ;;  %p123_p7 = scmp.lt.s32.totalorder %s117_s18, %s117_s18 }
  0x13   :  { %p124_p8 = por %p123_p7, %p122_p6 }
  0x15   :  { %p125_p9 = pnand %p124_p8, %p118_p5 }
  0x17   :  { %128 = shalt.err (!%p125_p9)
}
  0x18   :  { %31 = dma.hbm_to_vmem [thread:$0]  %s191_s1, 512, %s29_s17, [#allocation6]  }
  0x19   :  { %149 = dma.done.wait [#allocation3], 1024  }
  0x1a   :  { %150 = vsyncadd [#allocation3], 4294966272 }
  0x1b   :  { %151 = dma.done.wait [#allocation6], 512  }
  0x1c   :  { %152 = vsyncadd [#allocation6], 4294966784  ;;  %v38_v0 = vld [vmem:[#allocation2] sm:$0xff]  ;;  %v39_v2 = vld [vmem:[#allocation2 + $0x8] sm:$0xff]  ;;  %s159_s0 = smov [#allocation7]  }
  0x1d   :  { %v46_v1 = vld [vmem:[#allocation5] sm:$0xff]  ;;  %v47_v4 = vld [vmem:[#allocation5 + $0x8] sm:$0xff]  ;;  %v40_v5 = vld [vmem:[#allocation2 + $0x10] sm:$0xff]  ;;  %s71_s21 = sshll.u32 %s159_s0, 4  ;;  %s72_s21 = int_to_ptr.vmem [resolvable:$true] %s71_s21 }
  0x1e   :  { %v50_v3 = vadd.f32 %v46_v1, %v38_v0  ;;  %v48_v6 = vld [vmem:[#allocation5 + $0x10] sm:$0xff]  ;;  %v51_v7 = vadd.f32 %v47_v4, %v39_v2  ;;  %v41_v9 = vld [vmem:[#allocation2 + $0x18] sm:$0xff]  ;;  %v42_v11 = vld [vmem:[#allocation2 + $0x20] sm:$0xff]  ;;  %s129_s1 = scalar_lea.vmem %s72_s21, 1024  ;;  %p134_p11 = scmp.lt.s32.totalorder %s72_s21, %s72_s21 }
  0x1f   :  { %v52_v8 = vadd.f32 %v48_v6, %v40_v5  ;;  %v49_v10 = vld [vmem:[#allocation5 + $0x18] sm:$0xff]  ;;  %v54_v13 = vadd.f32 %v46_v1, %v42_v11  ;;  %v43_v14 = vld [vmem:[#allocation2 + $0x28] sm:$0xff]  ;;  %v44_v15 = vld [vmem:[#allocation2 + $0x30] sm:$0xff]  ;;  %p130_p10 = scmp.ne.s32.totalorder %s72_s21, %s129_s1  ;;  %p135_p12 = scmp.lt.s32.totalorder %s129_s1, %s129_s1 }
  0x20   :  { %58 = vst [vmem:[#allocation7] sm:$0xff] %v50_v3  ;;  %v53_v12 = vadd.f32 %v49_v10, %v41_v9  ;;  %v45_v16 = vld [vmem:[#allocation2 + $0x38] sm:$0xff]  ;;  %59 = vst [vmem:[#allocation7 + $0x8] sm:$0xff] %v51_v7  ;;  %v55_v17 = vadd.f32 %v47_v4, %v43_v14  ;;  %v56_v18 = vadd.f32 %v48_v6, %v44_v15 }
  0x21   :  { %60 = vst [vmem:[#allocation7 + $0x10] sm:$0xff] %v52_v8  ;;  %v57_v19 = vadd.f32 %v49_v10, %v45_v16  ;;  %62 = vst [vmem:[#allocation7 + $0x20] sm:$0xff] %v54_v13  ;;  %p136_p13 = por %p135_p12, %p134_p11 }
  0x22   :  { %61 = vst [vmem:[#allocation7 + $0x18] sm:$0xff] %v53_v12  ;;  %63 = vst [vmem:[#allocation7 + $0x28] sm:$0xff] %v55_v17 }
  0x23   :  { %64 = vst [vmem:[#allocation7 + $0x30] sm:$0xff] %v56_v18  ;;  %65 = vst [vmem:[#allocation7 + $0x38] sm:$0xff] %v57_v19  ;;  %p137_p0 = pnand %p136_p13, %p130_p10 }
  0x25   :  { %140 = shalt.err (!%p137_p0)
}
  0x26   :  { %77 = dma.vmem_to_hbm [thread:$0]  %s72_s21, 1024, %s192_s2, [#allocation4], %s156_s12, %s156_s12, %s157_s13  }
  0x27   :  { %153 = dma.done.wait [#allocation4], 1024  }
  0x28   :  { %154 = vsyncadd [#allocation4], 4294966272 }
  0x29   :  { %81 = vsyncpa [#allocation3], 1 }
  0x2a   :  { %82 = vsyncpa [#allocation6], 1 }
  0x2b   :  { %83 = vsyncpa [#allocation4], 1 }

</bundles_post_ra>
